<compile_context>
chip_gen: v7x
topology: tpu7x:2x2x1
jax: 0.10.0
libtpu: 0.0.40
codegen_flags: <defaults>
</compile_context>

<pallas_src>
import functools

import jax
import jax.numpy as jnp
from jax.experimental import pallas as pl
from jax.experimental.pallas import tpu as pltpu


def aenmf_kernel(x_ref, w_enc_ref, b_enc_ref, w_dec_ref, b_dec_ref, out_ref):
    x = x_ref[...]                                  # (tm, D_in)
    w_enc = w_enc_ref[...]                          # (D_in, L)   pre-transposed
    w_dec = w_dec_ref[...]                          # (L, D_in)   pre-transposed
    # h = x @ W_enc^T + b_enc  (plain NN contraction thanks to pre-transpose)
    h = jnp.dot(x, w_enc, preferred_element_type=jnp.float32) + b_enc_ref[...]
    # y = h @ W_dec^T + b_dec
    y = (jnp.dot(h.astype(w_dec.dtype), w_dec, preferred_element_type=jnp.float32)
         + b_dec_ref[...])
    out_ref[...] = y.astype(out_ref.dtype)


@functools.partial(jax.jit, static_argnames=("block_rows",))
def aenmf_forward(x, w_enc, b_enc, w_dec, b_dec, *, block_rows=512):
    """Fused encoder+decoder forward pass, tiled over the batch dimension."""
    B, D = x.shape
    L = w_enc.shape[0]

    # One-time XLA-side transposes: weights become NN-contraction operands and
    # are DMA'd into VMEM once (constant index_map) for the whole grid.
    w_enc_t = jnp.asarray(w_enc).T                          # (D, L)
    w_dec_t = jnp.asarray(w_dec).T                          # (L, D)
    b_enc2 = jnp.asarray(b_enc).reshape(1, L).astype(jnp.float32)
    b_dec2 = jnp.asarray(b_dec).reshape(1, D).astype(jnp.float32)

    # --- choose batch tile size (multiple of 8, fits a conservative VMEM budget)
    x_itemsize = jnp.dtype(x.dtype).itemsize
    w_itemsize = jnp.dtype(w_enc_t.dtype).itemsize
    weights_bytes = 2 * D * L * w_itemsize + (L + D) * 4    # resident weights+biases

    def tiles_bytes(tm_):
        # 2x double-buffered input tiles + 2x output tiles + f32 intermediates
        return 4 * tm_ * D * x_itemsize + 2 * tm_ * (L + D) * 4

    VMEM_BUDGET = 48 * 2**20                                # headroom under v7x's 64 MiB
    if B <= block_rows:
        tm = max(8, -(-B // 8) * 8)          # round small batches up to a sublane multiple
    else:
        tm = block_rows                      # 512: multiple of 8 and 128
    while tm > 8 and weights_bytes + tiles_bytes(tm) > VMEM_BUDGET:
        tm = max(8, (tm // 2 // 8) * 8)

    B_pad = -(-B // tm) * tm
    if B_pad != B:
        x = jnp.pad(x, ((0, B_pad - B), (0, 0)))
    grid = (B_pad // tm,)

    vmem_limit = int(min(64 * 2**20,
                         max(16 * 2**20,
                             int(1.5 * (weights_bytes + tiles_bytes(tm))))))

    out = pl.pallas_call(
        aenmf_kernel,
        out_shape=jax.ShapeDtypeStruct((B_pad, D), x.dtype),
        grid=grid,
        in_specs=[
            pl.BlockSpec((tm, D), lambda i: (i, 0)),   # x tile (streamed)
            pl.BlockSpec((D, L), lambda i: (0, 0)),    # W_enc^T (resident)
            pl.BlockSpec((1, L), lambda i: (0, 0)),    # b_enc   (resident)
            pl.BlockSpec((L, D), lambda i: (0, 0)),    # W_dec^T (resident)
            pl.BlockSpec((1, D), lambda i: (0, 0)),    # b_dec   (resident)
        ],
        out_specs=pl.BlockSpec((tm, D), lambda i: (i, 0)),
        compiler_params=pltpu.CompilerParams(
            dimension_semantics=("parallel",),
            vmem_limit_bytes=vmem_limit,
        ),
    )(x, w_enc_t, b_enc2, w_dec_t, b_dec2)

    return out[:B] if B_pad != B else out


def init_params(key, input_dim, latent_dim):
    """Parameter init mirroring the PyTorch module:
    - weights ~ Uniform(0, 1), then clamp(min=0) (no-op for U(0,1), kept for fidelity)
    - biases keep the nn.Linear default: Uniform(-1/sqrt(fan_in), 1/sqrt(fan_in))
    """
    k1, k2, k3, k4 = jax.random.split(key, 4)
    w_enc = jax.random.uniform(k1, (latent_dim, input_dim), jnp.float32, 0.0, 1.0)
    w_dec = jax.random.uniform(k2, (input_dim, latent_dim), jnp.float32, 0.0, 1.0)
    w_enc = jnp.maximum(w_enc, 0.0)
    w_dec = jnp.maximum(w_dec, 0.0)
    bound_enc = 1.0 / jnp.sqrt(jnp.float32(input_dim))
    bound_dec = 1.0 / jnp.sqrt(jnp.float32(latent_dim))
    b_enc = jax.random.uniform(k3, (latent_dim,), jnp.float32, -bound_enc, bound_enc)
    b_dec = jax.random.uniform(k4, (input_dim,), jnp.float32, -bound_dec, bound_dec)
    return w_enc, b_enc, w_dec, b_dec


if __name__ == "__main__":
    key = jax.random.PRNGKey(0)
    batch, input_dim, latent_dim = 16, 32, 8

    kx, kp = jax.random.split(key)
    # non-negative input data, as expected for NMF
    x = jax.random.uniform(kx, (batch, input_dim), jnp.float32, 0.0, 1.0)
    w_enc, b_enc, w_dec, b_dec = init_params(kp, input_dim, latent_dim)

    out = aenmf_forward(x, w_enc, b_enc, w_dec, b_dec)
    out = jax.block_until_ready(out)

    # pure-JAX reference check
    ref = (x @ w_enc.T + b_enc) @ w_dec.T + b_dec
    assert out.shape == (batch, input_dim)
    assert jnp.allclose(out, ref, atol=1e-4, rtol=1e-5), "mismatch vs reference"

    print("KERNEL_OK")
</pallas_src>

<mosaic_0001>
module attributes {stable_mosaic.version = 11 : i64} {
  func.func @aenmf_kernel(%arg0: i32, %arg1: memref<16x32xf32, #tpu.memory_space<vmem>>, %arg2: memref<32x8xf32, #tpu.memory_space<vmem>>, %arg3: memref<1x8xf32, #tpu.memory_space<vmem>>, %arg4: memref<8x32xf32, #tpu.memory_space<vmem>>, %arg5: memref<1x32xf32, #tpu.memory_space<vmem>>, %arg6: memref<16x32xf32, #tpu.memory_space<vmem>>) attributes {dimension_semantics = [#tpu.dimension_semantics<parallel>], iteration_bounds = array<i64: 1>, scalar_prefetch = 0 : i64, scratch_operands = 0 : i64, tpu.core_type = #tpu.core_type<tc>, window_params = [{transform_indices = @transform_0, window_bounds = array<i64: 16, 32>}, {pipeline_mode = #tpu.pipeline_mode<synchronous>, transform_indices = @transform_1, window_bounds = array<i64: 32, 8>}, {pipeline_mode = #tpu.pipeline_mode<synchronous>, transform_indices = @transform_2, window_bounds = array<i64: 1, 8>}, {pipeline_mode = #tpu.pipeline_mode<synchronous>, transform_indices = @transform_3, window_bounds = array<i64: 8, 32>}, {pipeline_mode = #tpu.pipeline_mode<synchronous>, transform_indices = @transform_4, window_bounds = array<i64: 1, 32>}, {transform_indices = @transform_5, window_bounds = array<i64: 16, 32>}]} {
    %c0 = arith.constant 0 : index
    %c0_0 = arith.constant 0 : index
    %0 = vector.load %arg1[%c0, %c0_0] : memref<16x32xf32, #tpu.memory_space<vmem>>, vector<16x32xf32>
    %c0_1 = arith.constant 0 : index
    %c0_2 = arith.constant 0 : index
    %1 = vector.load %arg2[%c0_1, %c0_2] : memref<32x8xf32, #tpu.memory_space<vmem>>, vector<32x8xf32>
    %c0_3 = arith.constant 0 : index
    %c0_4 = arith.constant 0 : index
    %2 = vector.load %arg4[%c0_3, %c0_4] : memref<8x32xf32, #tpu.memory_space<vmem>>, vector<8x32xf32>
    %cst = arith.constant dense<0.000000e+00> : vector<16x8xf32>
    %3 = tpu.matmul %0, %1, %cst {dimension_numbers = #tpu.dot_dimension_numbers<[1], [0], [0], [1], [0, 0, 1, 1], [], []>} : vector<16x32xf32>, vector<32x8xf32>, vector<16x8xf32> -> vector<16x8xf32>
    %c0_5 = arith.constant 0 : index
    %c0_6 = arith.constant 0 : index
    %4 = vector.load %arg3[%c0_5, %c0_6] : memref<1x8xf32, #tpu.memory_space<vmem>>, vector<1x8xf32>
    %5 = vector.broadcast %4 : vector<1x8xf32> to vector<16x8xf32>
    %6 = arith.addf %3, %5 : vector<16x8xf32>
    %cst_7 = arith.constant dense<0.000000e+00> : vector<16x32xf32>
    %7 = tpu.matmul %6, %2, %cst_7 {dimension_numbers = #tpu.dot_dimension_numbers<[1], [0], [0], [1], [0, 0, 1, 1], [], []>} : vector<16x8xf32>, vector<8x32xf32>, vector<16x32xf32> -> vector<16x32xf32>
    %c0_8 = arith.constant 0 : index
    %c0_9 = arith.constant 0 : index
    %8 = vector.load %arg5[%c0_8, %c0_9] : memref<1x32xf32, #tpu.memory_space<vmem>>, vector<1x32xf32>
    %9 = vector.broadcast %8 : vector<1x32xf32> to vector<16x32xf32>
    %10 = arith.addf %7, %9 : vector<16x32xf32>
    %c0_10 = arith.constant 0 : index
    %c0_11 = arith.constant 0 : index
    %11 = vector.load %arg6[%c0_10, %c0_11] : memref<16x32xf32, #tpu.memory_space<vmem>>, vector<16x32xf32>
    tpu.vector_store %arg6[%c0_10, %c0_11], %10 {strides = array<i32>} : memref<16x32xf32, #tpu.memory_space<vmem>>, vector<16x32xf32>,
    return
  }
  func.func @transform_0(%arg0: i32) -> (i32, i32) {
    %c0_i32 = arith.constant 0 : i32
    %c0_i32_0 = arith.constant 0 : i32
    return %arg0, %c0_i32 : i32, i32
  }
  func.func @transform_1(%arg0: i32) -> (i32, i32) {
    %c0_i32 = arith.constant 0 : i32
    %c0_i32_0 = arith.constant 0 : i32
    %c0_i32_1 = arith.constant 0 : i32
    return %c0_i32, %c0_i32_0 : i32, i32
  }
  func.func @transform_2(%arg0: i32) -> (i32, i32) {
    %c0_i32 = arith.constant 0 : i32
    %c0_i32_0 = arith.constant 0 : i32
    %c0_i32_1 = arith.constant 0 : i32
    return %c0_i32, %c0_i32_0 : i32, i32
  }
  func.func @transform_3(%arg0: i32) -> (i32, i32) {
    %c0_i32 = arith.constant 0 : i32
    %c0_i32_0 = arith.constant 0 : i32
    %c0_i32_1 = arith.constant 0 : i32
    return %c0_i32, %c0_i32_0 : i32, i32
  }
  func.func @transform_4(%arg0: i32) -> (i32, i32) {
    %c0_i32 = arith.constant 0 : i32
    %c0_i32_0 = arith.constant 0 : i32
    %c0_i32_1 = arith.constant 0 : i32
    return %c0_i32, %c0_i32_0 : i32, i32
  }
  func.func @transform_5(%arg0: i32) -> (i32, i32) {
    %c0_i32 = arith.constant 0 : i32
    %c0_i32_0 = arith.constant 0 : i32
    return %arg0, %c0_i32 : i32, i32
  }
}

</mosaic_0001>

<bundles_post_ra>
// kernel: aenmf_forward.1
= control target key start
LH: loop header
LB: loop body
LE: loop exit
PB: predicated region body
PF: predicated region fallthrough
CT: control target
= control target key end

     0   :  { %vm35_vm0 = vcmask 261120   ;;  %s366_s0 = inlined_call_operand.vmem [shape: f32[16,32], index: 0, kind: input, shape index: {}]   ;;  %s367_s1 = inlined_call_operand.vmem [shape: f32[32,8], index: 1, kind: input, shape index: {}]   ;;  %s368_s2 = inlined_call_operand.vmem [shape: f32[1,8], index: 2, kind: input, shape index: {}]   ;;  %s369_s3 = inlined_call_operand.vmem [shape: f32[8,32], index: 3, kind: input, shape index: {}]   ;;  %s370_s4 = inlined_call_operand.vmem [shape: f32[1,32], index: 4, kind: input, shape index: {}]   ;;  %s371_s5 = inlined_call_operand.hbm [shape: f32[16,32], index: 5, kind: output, shape index: {}]  }
   0x1   :  { %v23_v0 = vld [vmem:[%s367_s1] sm:$0xff]  ;;  %v24_v1 = vld [vmem:[%s367_s1 + $0x8] sm:$0xff]  ;;  %v25_v2 = vld [vmem:[%s367_s1 + $0x10] sm:$0xff] }
   0x2   :  { %v255_v3 = vpack.c.bf16 %v24_v1, %v23_v0  ;;  %v26_v4 = vld [vmem:[%s367_s1 + $0x18] sm:$0xff]  ;;  %v21_v5 = vld [vmem:[%s366_s0] sm:$0xff] }
   0x3   :  { %v259_v6 = vpack.c.bf16 %v26_v4, %v25_v2  ;;  %247 = vmatprep.mubr.msk.f32.mxu0 %vm35_vm0, %v21_v5 }
   0x4   :  { %10 = vsyncpa [#allocation3], 0  ;;  %256 = vmatprep.subr.bf16.mxu0 %v255_v3  ;;  %v22_v7 = vld [vmem:[%s366_s0 + $0x8] sm:$0xff]  ;;  %v27_v8 = vld [vmem:[%s369_s3] sm:$0xff]  ;;  %vm124_vm1 = vcmask 64512   ;;  %s290_s9 = smov [#allocation2]  }
   0x5   :  { %258 = vmatpush3.bf16.msra.mxu0 %v255_v3  ;;  %250 = vmatprep.subr.mxu1 %v27_v8  ;;  %v224_v9 = vld [vmem:[%s368_s2] ss:$0 sm:$0xff]  ;;  %s213_s10 = sshll.u32 %s290_s9, 4  ;;  %s214_s10 = int_to_ptr.vmem [resolvable:$true] %s213_s10 }
   0x6   :  { %260 = vmatprep.subr.bf16.mxu0 %v259_v6  ;;  %251 = vmatpush3.msra.mxu1 %v27_v8  ;;  %v227_v14 = vld [vmem:[%s370_s4] ss:$0 sm:$0xff]  ;;  %s266_s2 = scalar_lea.vmem %s214_s10, 256  ;;  %p271_p1 = scmp.lt.s32.totalorder %s214_s10, %s214_s10 }
   0x7   :  { %p267_p0 = scmp.ne.s32.totalorder %s214_s10, %s266_s2  ;;  %p272_p2 = scmp.lt.s32.totalorder %s266_s2, %s266_s2 }
   0x9   :  { %262 = vmatpush3.bf16.msra.mxu0 %v259_v6  ;;  %p273_p3 = por %p272_p2, %p271_p1 }
   0xb   :  { %p274_p4 = pnand %p273_p3, %p267_p0 }
   0xc   :  { %248 = vmatmul.mubr.msk.f32.vlgmr.msra.gmra.mrb[0].mxu0 %vm35_vm0, %v22_v7 }
  0xdf   :  { %v249_v10 = vpop.f32.mrb[0].mxu0 }
  0xe0   :  { %v108_v11 = vpop.f32.mrb[1].mxu0  ;;  %v114_v13 = vadd.f32 %v249_v10, %v224_v9 }
  0xe1   :  { %v109_v12 = vadd.f32 %v224_v9, %v108_v11 }
  0xe3   :  { %252 = vmatprep.mubr.msk.f32.mxu1 %vm124_vm1, %v109_v12 }
  0xe4   :  { %253 = vmatmul.mubr.msk.f32.vlgmr.msra.gmra.mrb[0].mxu1 %vm124_vm1, %v114_v13 }
 0x1b7   :  { %v254_v15 = vpop.f32.mrb[0].mxu1 }
 0x1b8   :  { %v203_v16 = vadd.f32 %v254_v15, %v227_v14  ;;  %v197_v17 = vpop.f32.mrb[1].mxu1 }
 0x1b9   :  { %v198_v18 = vadd.f32 %v227_v14, %v197_v17 }
 0x1ba   :  { %207 = vst.msk [vmem:[#allocation2 + $0x8] sm:$0xff] %vm35_vm0, %v203_v16 }
 0x1bb   :  { %206 = vst.msk [vmem:[#allocation2] sm:$0xff] %vm35_vm0, %v198_v18 }
 0x1bc   :  { %277 = shalt.err (!%p274_p4)
}
 0x1bd   :  { %s278_s11 = scalar_lea.hbm %s371_s5, 256 }
 0x1be   :  { %p279_p5 = scmp.ne.s32.totalorder %s371_s5, %s278_s11  ;;  %p282_p6 = scmp.lt.u32.totalorder %s278_s11, %s371_s5 }
 0x1c0   :  { %p284_p7 = pnand %p282_p6, %p279_p5 }
 0x1c2   :  { %287 = shalt.err (!%p284_p7)
}
 0x1c3   :  { %s291_s16 = smov 128   ;;  %s292_s17 = smov 8  }
 0x1c4   :  { %219 = dma.vmem_to_hbm [thread:$0]  %s214_s10, 256, %s371_s5, [#allocation3], %s291_s16, %s291_s16, %s292_s17  }
 0x1c5   :  { %288 = dma.done.wait [#allocation3], 256  }
 0x1c6   :  { %289 = vsyncadd [#allocation3], 4294967040 }
 0x1c7   :  { %223 = vsyncpa [#allocation3], 1 }

</bundles_post_ra>
